<compile_context>
chip_gen: v6e
topology: v6e:2x2x1
jax: 0.10.0
libtpu: 0.0.40
codegen_flags: <defaults>
</compile_context>

<pallas_src>
import jax
import jax.numpy as jnp
from jax.experimental import pallas as pl
from jax.experimental.pallas import tpu as pltpu

NUM_FEATURES = 3
NUM_CLASSES = 2
HIDDEN = 30
HIDDEN_PAD = 128          # hidden width padded to a full lane register
S2S_STEPS = 7
LIN1_OUT = 15


def _round_up(v, m):
    return (v + m - 1) // m * m


def _pad2d(m, rows, cols):
    out = jnp.zeros((rows, cols), jnp.float32)
    return out.at[: m.shape[0], : m.shape[1]].set(m.astype(jnp.float32))


# --------------------------------------------------------------------------- #
# GCN layer kernel: h = ReLU((A @ X) @ W + b), tiled over the node dimension.  #
# --------------------------------------------------------------------------- #
def _gcn_layer_kernel(adj_ref, x_ref, w_ref, b_ref, out_ref, acc_ref):
    j = pl.program_id(1)

    @pl.when(j == 0)
    def _():
        acc_ref[...] = jnp.zeros_like(acc_ref)

    a = adj_ref[...].astype(jnp.float32)          # bf16 in memory, f32 on the MXU
    acc_ref[...] += jnp.dot(a, x_ref[...], preferred_element_type=jnp.float32)

    @pl.when(j == pl.num_programs(1) - 1)
    def _():
        h = jnp.dot(acc_ref[...], w_ref[...], preferred_element_type=jnp.float32)
        out_ref[...] = jnp.maximum(h + b_ref[...], 0.0)


def _gcn_layer(adj_bf16, x_f32, w_pad, b_pad, tile):
    n_pad = adj_bf16.shape[0]
    f_in = x_f32.shape[1]
    grid = (n_pad // tile, n_pad // tile)
    flops = 2 * n_pad * n_pad * f_in + 2 * n_pad * f_in * HIDDEN_PAD
    bytes_accessed = (adj_bf16.size * 2 + x_f32.size * 4
                      + w_pad.size * 4 + n_pad * HIDDEN_PAD * 4)
    return pl.pallas_call(
        _gcn_layer_kernel,
        out_shape=jax.ShapeDtypeStruct((n_pad, HIDDEN_PAD), jnp.float32),
        grid_spec=pltpu.PrefetchScalarGridSpec(
            num_scalar_prefetch=0,
            grid=grid,
            in_specs=[
                pl.BlockSpec((tile, tile), lambda i, j: (i, j)),        # A tile
                pl.BlockSpec((tile, f_in), lambda i, j: (j, 0)),        # X rows
                pl.BlockSpec((f_in, HIDDEN_PAD), lambda i, j: (0, 0)),  # W (resident)
                pl.BlockSpec((1, HIDDEN_PAD), lambda i, j: (0, 0)),     # b (resident)
            ],
            out_specs=pl.BlockSpec((tile, HIDDEN_PAD), lambda i, j: (i, 0)),
            scratch_shapes=[pltpu.VMEM((tile, f_in), jnp.float32)],
        ),
        compiler_params=pltpu.CompilerParams(
            dimension_semantics=("parallel", "arbitrary")),
        cost_estimate=pl.CostEstimate(
            flops=int(flops), transcendentals=0,
            bytes_accessed=int(bytes_accessed)),
    )(adj_bf16, x_f32, w_pad, b_pad)


# --------------------------------------------------------------------------- #
# Set2Set(30, 7) + Linear(60,15) + ReLU + Linear(15,2), single graph.          #
# --------------------------------------------------------------------------- #
def _sigmoid(v):
    return 1.0 / (1.0 + jnp.exp(-v))


def _set2set_head_kernel(x_ref, wih_q_ref, wih_r_ref, whh_ref, b_lstm_ref,
                         wl1_q_ref, wl1_r_ref, bl1_ref, wl2_ref, bl2_ref, out_ref):
    x = x_ref[...]                                    # [N, 30] node embeddings, f32
    wih_q = wih_q_ref[...]                            # [30, 120]  (q half of W_ih)
    wih_r = wih_r_ref[...]                            # [30, 120]  (r half of W_ih)
    whh = whh_ref[...]                                # [30, 120]
    b_lstm = b_lstm_ref[...]                          # [1, 120], gate order i|f|g|o

    q = jnp.zeros((1, HIDDEN), jnp.float32)           # q_star = [q, r] starts at 0
    r = jnp.zeros((1, HIDDEN), jnp.float32)
    h = jnp.zeros((1, HIDDEN), jnp.float32)
    c = jnp.zeros((1, HIDDEN), jnp.float32)

    for _ in range(S2S_STEPS):                        # static unroll, tiny per step
        gates = (jnp.dot(q, wih_q, preferred_element_type=jnp.float32)
                 + jnp.dot(r, wih_r, preferred_element_type=jnp.float32)
                 + jnp.dot(h, whh, preferred_element_type=jnp.float32)
                 + b_lstm)                            # [1, 120]
        i_g = _sigmoid(gates[:, 0 * HIDDEN:1 * HIDDEN])
        f_g = _sigmoid(gates[:, 1 * HIDDEN:2 * HIDDEN])
        g_g = jnp.tanh(gates[:, 2 * HIDDEN:3 * HIDDEN])
        o_g = _sigmoid(gates[:, 3 * HIDDEN:4 * HIDDEN])
        c = f_g * c + i_g * g_g
        h = o_g * jnp.tanh(c)
        q = h                                         # [1, 30]

        # attention over all nodes of the (single) graph
        e = jnp.sum(x * q, axis=1, keepdims=True)     # [N, 1]
        e_max = jnp.max(e, axis=0, keepdims=True)
        p = jnp.exp(e - e_max)
        a = p / jnp.sum(p, axis=0, keepdims=True)     # softmax over nodes
        r = jnp.sum(a * x, axis=0, keepdims=True)     # [1, 30]

    # lin1([q, r]) -> ReLU -> lin2 (q_star concat expressed as split weights)
    z = jnp.maximum(
        jnp.dot(q, wl1_q_ref[...], preferred_element_type=jnp.float32)
        + jnp.dot(r, wl1_r_ref[...], preferred_element_type=jnp.float32)
        + bl1_ref[...], 0.0)                          # [1, 15]
    out_ref[...] = (jnp.dot(z, wl2_ref[...], preferred_element_type=jnp.float32)
                    + bl2_ref[...])                   # [1, num_classes]


def _set2set_head(h_nodes, params):
    w_ih = params["w_ih"]
    w_lin1 = params["w_lin1"]
    return pl.pallas_call(
        _set2set_head_kernel,
        out_shape=jax.ShapeDtypeStruct((1, NUM_CLASSES), jnp.float32),
    )(
        h_nodes,
        w_ih[:HIDDEN, :], w_ih[HIDDEN:, :], params["w_hh"], params["b_lstm"],
        w_lin1[:HIDDEN, :], w_lin1[HIDDEN:, :], params["b_lin1"],
        params["w_lin2"], params["b_lin2"],
    )


# --------------------------------------------------------------------------- #
# Graph preprocessing & parameters.                                            #
# --------------------------------------------------------------------------- #
def build_gcn_adj(edge_index, edge_weights, num_nodes):
    """Dense GCN-normalized adjacency D^-1/2 (A + I) D^-1/2 (PyG GCNConv defaults).

    Follows PyG's gcn_norm convention (degrees from the target index, self loops
    with weight 1); the example graph is undirected so this is symmetric.
    """
    row, col = edge_index[0], edge_index[1]
    if edge_weights is None:
        edge_weights = jnp.ones(row.shape[0], dtype=jnp.float32)
    loop = jnp.arange(num_nodes, dtype=row.dtype)
    row = jnp.concatenate([row, loop])
    col = jnp.concatenate([col, loop])
    w = jnp.concatenate([edge_weights.astype(jnp.float32),
                         jnp.ones(num_nodes, jnp.float32)])
    deg = jnp.zeros(num_nodes, jnp.float32).at[col].add(w)
    dinv = jnp.where(deg > 0, jax.lax.rsqrt(deg), 0.0)
    vals = dinv[row] * w * dinv[col]
    # aggregation at the target node: out[col] += vals * x[row]  ->  A[col, row]
    return jnp.zeros((num_nodes, num_nodes), jnp.float32).at[col, row].add(vals)


def init_params(key):
    ks = jax.random.split(key, 11)

    def nrm(k, shape, scale):
        return jax.random.normal(k, shape, jnp.float32) * scale

    return {
        "w1": nrm(ks[0], (NUM_FEATURES, HIDDEN), 1.0 / jnp.sqrt(NUM_FEATURES)),
        "b1": nrm(ks[1], (1, HIDDEN), 0.01),
        "w2": nrm(ks[2], (HIDDEN, HIDDEN), 1.0 / jnp.sqrt(HIDDEN)),
        "b2": nrm(ks[3], (1, HIDDEN), 0.01),
        # LSTM(input=60, hidden=30); b_lstm = b_ih + b_hh, gate order i|f|g|o
        "w_ih": nrm(ks[4], (2 * HIDDEN, 4 * HIDDEN), 1.0 / jnp.sqrt(2 * HIDDEN)),
        "w_hh": nrm(ks[5], (HIDDEN, 4 * HIDDEN), 1.0 / jnp.sqrt(HIDDEN)),
        "b_lstm": nrm(ks[6], (1, 4 * HIDDEN), 0.01),
        "w_lin1": nrm(ks[7], (2 * HIDDEN, LIN1_OUT), 1.0 / jnp.sqrt(2 * HIDDEN)),
        "b_lin1": nrm(ks[8], (1, LIN1_OUT), 0.01),
        "w_lin2": nrm(ks[9], (LIN1_OUT, NUM_CLASSES), 1.0 / jnp.sqrt(LIN1_OUT)),
        "b_lin2": nrm(ks[10], (1, NUM_CLASSES), 0.01),
    }


# --------------------------------------------------------------------------- #
# Forward pass.                                                                #
# --------------------------------------------------------------------------- #
def survey_houses_color_set2set_forward(x, edge_index, params, edge_weights=None):
    n = x.shape[0]
    adj = build_gcn_adj(edge_index, edge_weights, n)        # f32 [n, n]

    # Node-dimension tiling: single block for small graphs, 256-node tiles otherwise.
    tile = _round_up(n, 8) if n <= 256 else 256
    n_pad = _round_up(n, tile)

    adj_p = _pad2d(adj, n_pad, n_pad).astype(jnp.bfloat16)  # bf16: half the bytes
    x_p = _pad2d(x, n_pad, x.shape[1])

    w1 = _pad2d(params["w1"], NUM_FEATURES, HIDDEN_PAD)
    b1 = _pad2d(params["b1"], 1, HIDDEN_PAD)
    w2 = _pad2d(params["w2"], HIDDEN_PAD, HIDDEN_PAD)
    b2 = _pad2d(params["b2"], 1, HIDDEN_PAD)

    h1 = _gcn_layer(adj_p, x_p, w1, b1, tile)               # [n_pad, 128]
    h2 = _gcn_layer(adj_p, h1, w2, b2, tile)                # [n_pad, 128]
    h2 = h2[:n, :HIDDEN]                                    # drop padding before pooling

    return _set2set_head(h2, params)                        # [1, num_classes]


# --------------------------------------------------------------------------- #
# Pure-JAX reference of the same math (sanity check).                          #
# --------------------------------------------------------------------------- #
def _reference_forward(x, edge_index, params, edge_weights=None):
    n = x.shape[0]
    adj = build_gcn_adj(edge_index, edge_weights, n)
    x = x.astype(jnp.float32)
    h = jnp.maximum(adj @ (x @ params["w1"]) + params["b1"], 0.0)
    h = jnp.maximum(adj @ (h @ params["w2"]) + params["b2"], 0.0)

    q = jnp.zeros((1, HIDDEN), jnp.float32)
    r = jnp.zeros((1, HIDDEN), jnp.float32)
    hh = jnp.zeros((1, HIDDEN), jnp.float32)
    cc = jnp.zeros((1, HIDDEN), jnp.float32)
    for _ in range(S2S_STEPS):
        q_star = jnp.concatenate([q, r], axis=1)
        gates = q_star @ params["w_ih"] + hh @ params["w_hh"] + params["b_lstm"]
        i_g = jax.nn.sigmoid(gates[:, 0 * HIDDEN:1 * HIDDEN])
        f_g = jax.nn.sigmoid(gates[:, 1 * HIDDEN:2 * HIDDEN])
        g_g = jnp.tanh(gates[:, 2 * HIDDEN:3 * HIDDEN])
        o_g = jax.nn.sigmoid(gates[:, 3 * HIDDEN:4 * HIDDEN])
        cc = f_g * cc + i_g * g_g
        hh = o_g * jnp.tanh(cc)
        q = hh
        e = jnp.sum(h * q, axis=1, keepdims=True)
        a = jax.nn.softmax(e, axis=0)
        r = jnp.sum(a * h, axis=0, keepdims=True)
    q_star = jnp.concatenate([q, r], axis=1)
    z = jnp.maximum(q_star @ params["w_lin1"] + params["b_lin1"], 0.0)
    return z @ params["w_lin2"] + params["b_lin2"]


if __name__ == "__main__":
    key = jax.random.PRNGKey(0)
    k_param, k_x = jax.random.split(key)

    num_nodes = 16
    x = jax.random.normal(k_x, (num_nodes, NUM_FEATURES), jnp.float32)

    # Undirected ring graph (both directions), 32 directed edges total.
    src = jnp.arange(num_nodes, dtype=jnp.int32)
    dst = (src + 1) % num_nodes
    edge_index = jnp.stack(
        [jnp.concatenate([src, dst]), jnp.concatenate([dst, src])], axis=0)

    params = init_params(k_param)

    out = survey_houses_color_set2set_forward(x, edge_index, params)
    out = jax.block_until_ready(out)

    ref = _reference_forward(x, edge_index, params)
    assert out.shape == (1, NUM_CLASSES)
    assert jnp.allclose(out, ref, rtol=2e-2, atol=2e-2), (
        f"mismatch vs pure-JAX reference: {out} vs {ref}")

    print("KERNEL_OK")
</pallas_src>

<mosaic_0001>
module attributes {stable_mosaic.version = 11 : i64} {
  func.func @_gcn_layer_kernel(%arg0: i32, %arg1: i32, %arg2: memref<16x16xbf16, #tpu.memory_space<vmem>>, %arg3: memref<16x3xf32, #tpu.memory_space<vmem>>, %arg4: memref<3x128xf32, #tpu.memory_space<vmem>>, %arg5: memref<1x128xf32, #tpu.memory_space<vmem>>, %arg6: memref<16x128xf32, #tpu.memory_space<vmem>>, %arg7: memref<16x3xf32, #tpu.memory_space<vmem>>) attributes {dimension_semantics = [#tpu.dimension_semantics<parallel>, #tpu.dimension_semantics<arbitrary>], iteration_bounds = array<i64: 1, 1>, scalar_prefetch = 0 : i64, scratch_operands = 1 : i64, tpu.core_type = #tpu.core_type<tc>, window_params = [{transform_indices = @transform_0, window_bounds = array<i64: 16, 16>}, {transform_indices = @transform_1, window_bounds = array<i64: 16, 3>}, {pipeline_mode = #tpu.pipeline_mode<synchronous>, transform_indices = @transform_2, window_bounds = array<i64: 3, 128>}, {pipeline_mode = #tpu.pipeline_mode<synchronous>, transform_indices = @transform_3, window_bounds = array<i64: 1, 128>}, {transform_indices = @transform_4, window_bounds = array<i64: 16, 128>}]} {
    %c0_i32 = arith.constant 0 : i32
    %0 = arith.cmpi eq, %arg1, %c0_i32 : i32
    %1 = arith.extui %0 : i1 to i32
    %c0_i32_0 = arith.constant 0 : i32
    %2 = arith.cmpi ne, %1, %c0_i32_0 : i32
    scf.if %2 {
      %cst_10 = arith.constant 0.000000e+00 : f32
      %13 = vector.broadcast %cst_10 : f32 to vector<16x3xf32>
      %c0_11 = arith.constant 0 : index
      %c0_12 = arith.constant 0 : index
      %14 = vector.load %arg7[%c0_11, %c0_12] : memref<16x3xf32, #tpu.memory_space<vmem>>, vector<16x3xf32>
      tpu.vector_store %arg7[%c0_11, %c0_12], %13 {strides = array<i32>} : memref<16x3xf32, #tpu.memory_space<vmem>>, vector<16x3xf32>,
    } else {
    }
    %c0 = arith.constant 0 : index
    %c0_1 = arith.constant 0 : index
    %3 = vector.load %arg2[%c0, %c0_1] : memref<16x16xbf16, #tpu.memory_space<vmem>>, vector<16x16xbf16>
    %4 = arith.extf %3 : vector<16x16xbf16> to vector<16x16xf32>
    %c0_2 = arith.constant 0 : index
    %c0_3 = arith.constant 0 : index
    %5 = vector.load %arg7[%c0_2, %c0_3] : memref<16x3xf32, #tpu.memory_space<vmem>>, vector<16x3xf32>
    %c0_4 = arith.constant 0 : index
    %c0_5 = arith.constant 0 : index
    %6 = vector.load %arg3[%c0_4, %c0_5] : memref<16x3xf32, #tpu.memory_space<vmem>>, vector<16x3xf32>
    %cst = arith.constant dense<0.000000e+00> : vector<16x3xf32>
    %7 = tpu.matmul %4, %6, %cst {dimension_numbers = #tpu.dot_dimension_numbers<[1], [0], [0], [1], [0, 0, 1, 1], [], []>} : vector<16x16xf32>, vector<16x3xf32>, vector<16x3xf32> -> vector<16x3xf32>
    %8 = arith.addf %5, %7 : vector<16x3xf32>
    %c0_6 = arith.constant 0 : index
    %c0_7 = arith.constant 0 : index
    %9 = vector.load %arg7[%c0_6, %c0_7] : memref<16x3xf32, #tpu.memory_space<vmem>>, vector<16x3xf32>
    tpu.vector_store %arg7[%c0_6, %c0_7], %8 {strides = array<i32>} : memref<16x3xf32, #tpu.memory_space<vmem>>, vector<16x3xf32>,
    %c0_i32_8 = arith.constant 0 : i32
    %10 = arith.cmpi eq, %arg1, %c0_i32_8 : i32
    %11 = arith.extui %10 : i1 to i32
    %c0_i32_9 = arith.constant 0 : i32
    %12 = arith.cmpi ne, %11, %c0_i32_9 : i32
    scf.if %12 {
      %c0_10 = arith.constant 0 : index
      %c0_11 = arith.constant 0 : index
      %13 = vector.load %arg7[%c0_10, %c0_11] : memref<16x3xf32, #tpu.memory_space<vmem>>, vector<16x3xf32>
      %c0_12 = arith.constant 0 : index
      %c0_13 = arith.constant 0 : index
      %14 = vector.load %arg4[%c0_12, %c0_13] : memref<3x128xf32, #tpu.memory_space<vmem>>, vector<3x128xf32>
      %cst_14 = arith.constant dense<0.000000e+00> : vector<16x128xf32>
      %15 = tpu.matmul %13, %14, %cst_14 {dimension_numbers = #tpu.dot_dimension_numbers<[1], [0], [0], [1], [0, 0, 1, 1], [], []>} : vector<16x3xf32>, vector<3x128xf32>, vector<16x128xf32> -> vector<16x128xf32>
      %c0_15 = arith.constant 0 : index
      %c0_16 = arith.constant 0 : index
      %16 = vector.load %arg5[%c0_15, %c0_16] : memref<1x128xf32, #tpu.memory_space<vmem>>, vector<1x128xf32>
      %17 = vector.broadcast %16 : vector<1x128xf32> to vector<16x128xf32>
      %18 = arith.addf %15, %17 : vector<16x128xf32>
      %cst_17 = arith.constant 0.000000e+00 : f32
      %19 = vector.broadcast %cst_17 : f32 to vector<16x128xf32>
      %20 = arith.maximumf %18, %19 : vector<16x128xf32>
      %c0_18 = arith.constant 0 : index
      %c0_19 = arith.constant 0 : index
      %21 = vector.load %arg6[%c0_18, %c0_19] : memref<16x128xf32, #tpu.memory_space<vmem>>, vector<16x128xf32>
      tpu.vector_store %arg6[%c0_18, %c0_19], %20 {strides = array<i32>} : memref<16x128xf32, #tpu.memory_space<vmem>>, vector<16x128xf32>,
    } else {
    }
    return
  }
  func.func @transform_0(%arg0: i32, %arg1: i32) -> (i32, i32) {
    %c0_i32 = arith.constant 0 : i32
    return %arg0, %arg1 : i32, i32
  }
  func.func @transform_1(%arg0: i32, %arg1: i32) -> (i32, i32) {
    %c0_i32 = arith.constant 0 : i32
    %c0_i32_0 = arith.constant 0 : i32
    return %arg1, %c0_i32 : i32, i32
  }
  func.func @transform_2(%arg0: i32, %arg1: i32) -> (i32, i32) {
    %c0_i32 = arith.constant 0 : i32
    %c0_i32_0 = arith.constant 0 : i32
    %c0_i32_1 = arith.constant 0 : i32
    return %c0_i32, %c0_i32_0 : i32, i32
  }
  func.func @transform_3(%arg0: i32, %arg1: i32) -> (i32, i32) {
    %c0_i32 = arith.constant 0 : i32
    %c0_i32_0 = arith.constant 0 : i32
    %c0_i32_1 = arith.constant 0 : i32
    return %c0_i32, %c0_i32_0 : i32, i32
  }
  func.func @transform_4(%arg0: i32, %arg1: i32) -> (i32, i32) {
    %c0_i32 = arith.constant 0 : i32
    %c0_i32_0 = arith.constant 0 : i32
    return %arg0, %c0_i32 : i32, i32
  }
}

</mosaic_0001>

<bundles_post_ra>
// kernel: tpu_custom_call.1
= control target key start
LH: loop header
LB: loop body
LE: loop exit
PB: predicated region body
PF: predicated region fallthrough
CT: control target
= control target key end

     0   :  { %vm33_vm0 = vcmask 130048   ;;  %vm22_vm1 = vcmask 23552   ;;  %v293_v5 = vmov 0.0   ;;  %s346_s0 = inlined_call_operand.vmem [shape: bf16[16,16], index: 0, kind: input, shape index: {}]   ;;  %s347_s1 = inlined_call_operand.vmem [shape: f32[16,3], index: 1, kind: input, shape index: {}]   ;;  %s348_s2 = inlined_call_operand.vmem [shape: f32[3,128], index: 2, kind: input, shape index: {}]   ;;  %s349_s3 = inlined_call_operand.vmem [shape: f32[1,128], index: 3, kind: input, shape index: {}]   ;;  %s350_s4 = inlined_call_operand.hbm [shape: f32[16,128], index: 4, kind: output, shape index: {}]  }
   0x1   :  { %v32_v0 = vld [vmem:[%s347_s1 + $0x8] sm:$0xff]  ;;  %v31_v1 = vld [vmem:[%s347_s1] sm:$0xff]  ;;  %24 = vst.msk [vmem:[#allocation2 + $0x8] sm:$0xff] %vm22_vm1, %v293_v5  ;;  %23 = vst.msk [vmem:[#allocation2] sm:$0xff] %vm22_vm1, %v293_v5 }
   0x2   :  { %v245_v2 = vld [vmem:[%s346_s0] sm:$0xff]   ;;  %255 = vmatprep.subr.mxu0 %v32_v0 }
   0x3   :  { %v246_v3 = vunpack.c.l.bf16 %v245_v2  ;;  %v247_v4 = vunpack.c.h.bf16 %v245_v2 }
   0x4   :  { %9 = vsyncpa [#allocation4], 0  ;;  %256 = vmatpush3.msra.mxu0 %v32_v0  ;;  %v125_v6 = vld [vmem:[%s348_s2] sm:$0x7]  ;;  %vm139_vm2 = vcmask 1042432   ;;  %s294_s22 = smov [#allocation3]  }
   0x5   :  { %257 = vmatprep.subr.mxu0 %v31_v1  ;;  %259 = vmatprep.mubr.msk.f32.mxu0 %vm33_vm0, %v246_v3  ;;  %v240_v15 = vld [vmem:[%s349_s3] ss:$0 sm:$0xff]  ;;  %s227_s23 = sshll.u32 %s294_s22, 4  ;;  %s228_s23 = int_to_ptr.vmem [resolvable:$true] %s227_s23 }
   0x6   :  { %258 = vmatpush3.msra.mxu0 %v31_v1  ;;  %262 = vmatprep.subr.msk.mxu1 %vm139_vm2, %v125_v6  ;;  %s271_s24 = scalar_lea.vmem %s228_s23, 256  ;;  %p276_p1 = scmp.lt.s32.totalorder %s228_s23, %s228_s23 }
   0x7   :  { %260 = vmatmul.mubr.msk.f32.vlgmr.msra.gmra.mxu0 %vm33_vm0, %v247_v4  ;;  %263 = vmatpush3.msk.msra.mxu1 %vm139_vm2, %v125_v6  ;;  %p272_p0 = scmp.ne.s32.totalorder %s228_s23, %s271_s24  ;;  %p277_p2 = scmp.lt.s32.totalorder %s271_s24, %s271_s24 }
   0x8   :  { %v30_v7 = vld [vmem:[#allocation2 + $0x8] sm:$0xff]  ;;  %v29_v9 = vld [vmem:[#allocation2] sm:$0xff] }
   0x9   :  { %p278_p3 = por %p277_p2, %p276_p1 }
   0xb   :  { %p279_p4 = pnand %p278_p3, %p272_p0 }
  0xc7   :  { %v261_v8 = vpop.f32.mrf.mxu0 }
  0xc8   :  { %v116_v10 = vadd.f32 %v261_v8, %v30_v7 }
  0xc9   :  { %v106_v11 = vpop.f32.mrf.mxu0 }
  0xca   :  { %119 = vst.msk [vmem:[#allocation2 + $0x8] sm:$0xff] %vm22_vm1, %v116_v10  ;;  %v115_v12 = vadd.f32 %v106_v11, %v29_v9 }
  0xcc   :  { %118 = vst.msk [vmem:[#allocation2] sm:$0xff] %vm22_vm1, %v115_v12 }
  0xd1   :  { %v124_v14 = vld [vmem:[#allocation2 + $0x8] sm:$0xff] }
  0xd3   :  { %v123_v13 = vld [vmem:[#allocation2] sm:$0xff] }
  0xd4   :  { %264 = vmatprep.mubr.msk.f32.mxu1 %vm22_vm1, %v123_v13 }
  0xd5   :  { %265 = vmatmul.mubr.msk.f32.vlgmr.msra.gmra.mxu1 %vm22_vm1, %v124_v14 }
 0x195   :  { %v266_v16 = vpop.f32.mrf.mxu1 }
 0x196   :  { %v215_v17 = vadd.f32 %v266_v16, %v240_v15 }
 0x197   :  { %v209_v18 = vpop.f32.mrf.mxu1 }
 0x198   :  { %v219_v19 = vmax.f32 %v215_v17, 0.0  ;;  %v210_v20 = vadd.f32 %v240_v15, %v209_v18 }
 0x19a   :  { %221 = vst [vmem:[#allocation3 + $0x8] sm:$0xff] %v219_v19  ;;  %v218_v21 = vmax.f32 %v210_v20, 0.0 }
 0x19c   :  { %220 = vst [vmem:[#allocation3] sm:$0xff] %v218_v21 }
 0x19d   :  { %282 = shalt.err (!%p279_p4)
}
 0x19e   :  { %s295_s25 = smov 128   ;;  %s296_s3 = smov 8  }
 0x19f   :  { %233 = dma.vmem_to_hbm [thread:$0]  %s228_s23, 256, %s350_s4, [#allocation4], %s295_s25, %s295_s25, %s296_s3  }
 0x1a0   :  { %291 = dma.done.wait [#allocation4], 256  }
 0x1a1   :  { %292 = vsyncadd [#allocation4], 4294967040 }
 0x1a2   :  { %237 = vsyncpa [#allocation4], 1 }

</bundles_post_ra>
